<compile_context>
chip_gen: v7x
topology: tpu7x:2x2x1
jax: 0.10.0
libtpu: 0.0.40
codegen_flags: <defaults>
</compile_context>

<pallas_src>
import functools

import jax
import jax.numpy as jnp
from jax import lax
from jax.experimental import pallas as pl
from jax.experimental.pallas import tpu as pltpu


def _round_up(x, m):
    return ((x + m - 1) // m) * m


def _mix32(x):
    """murmur3-style 32-bit finalizer. Works on uint32 scalars and arrays."""
    x = x ^ (x >> 16)
    x = x * jnp.uint32(0x7FEB352D)
    x = x ^ (x >> 15)
    x = x * jnp.uint32(0x846CA68B)
    x = x ^ (x >> 16)
    return x


def _enhanced_linear_kernel(seed_ref, x_ref, w_ref, b_ref, o_ref, acc_ref, *,
                            tm, tn, n_padded, keep_threshold, keep_scale,
                            apply_dropout):
    # All grid-position reads hoisted to the top level of the kernel body
    # (calling pl.program_id inside a pl.when branch breaks interpret lowering).
    i = pl.program_id(0)
    j = pl.program_id(1)
    k = pl.program_id(2)
    k_last = pl.num_programs(2) - 1
    row_base = i * tm
    col_base = j * tn

    # Init the f32 accumulator on the first K step.
    @pl.when(k == 0)
    def _init():
        acc_ref[...] = jnp.zeros_like(acc_ref)

    # MXU matmul, f32 accumulation.
    acc_ref[...] += jnp.dot(x_ref[...], w_ref[...],
                            preferred_element_type=jnp.float32)

    # Epilogue (bias + ReLU + dropout) only once, on the last K step.
    @pl.when(k == k_last)
    def _finalize():
        y = acc_ref[...] + b_ref[...]            # bias broadcast over batch rows
        y = jnp.maximum(y, jnp.float32(0.0))     # ReLU

        if apply_dropout:
            # Inverted dropout (PyTorch training semantics): drop with prob p,
            # scale survivors by 1/(1-p).  Keep decision = integer hash of the
            # global element index mixed with the seed -> deterministic per
            # (seed, element) and identical regardless of tiling.
            row = row_base + lax.broadcasted_iota(jnp.int32, (tm, tn), 0)
            col = col_base + lax.broadcasted_iota(jnp.int32, (tm, tn), 1)
            idx = (row.astype(jnp.uint32) * jnp.uint32(n_padded)
                   + col.astype(jnp.uint32))
            seed_mix = _mix32(seed_ref[0].astype(jnp.uint32)
                              + jnp.uint32(0x9E3779B9))
            h = _mix32(idx ^ seed_mix)
            keep = h >= jnp.uint32(keep_threshold)
            y = jnp.where(keep, y * jnp.float32(keep_scale), jnp.float32(0.0))

        o_ref[...] = y.astype(o_ref.dtype)


def enhanced_linear(x, w, b, *, dropout_p=0.5, training=True, seed=0,
                    tm=256, tn=512, tk=512, use_bf16_matmul=False):
    """x: (B, IN) f32, w: (IN, OUT) f32, b: (OUT,) f32 -> (B, OUT) f32.

    Equivalent to torch: Dropout(p)(ReLU(Linear(IN, OUT)(x))) in training mode,
    and ReLU(Linear(IN, OUT)(x)) in eval mode.
    """
    B, IN = x.shape
    OUT = w.shape[1]

    # ---- dropout config (handle p in {None, 0, 1} safely) ----
    p = 0.0 if dropout_p is None else min(max(float(dropout_p), 0.0), 1.0)
    apply_dropout = bool(training) and p > 0.0
    if p >= 1.0:
        keep_threshold = 0xFFFFFFFF
        keep_scale = 0.0            # everything dropped -> zeros
    else:
        keep_threshold = min(int(round(p * 2.0 ** 32)), 0xFFFFFFFF)
        keep_scale = 1.0 / (1.0 - p)

    # ---- tile sizes: lane dims multiples of 128, sublane multiples of 8;
    #      clamp to the (padded) problem so tiny shapes stay a single tile.
    TM = _round_up(min(tm, _round_up(B, 8)), 8)
    TN = _round_up(min(tn, _round_up(OUT, 128)), 128)
    TK = _round_up(min(tk, _round_up(IN, 128)), 128)
    Mp = _round_up(B, TM)
    Np = _round_up(OUT, TN)     # lane-dense output (>=128, unmasked stores)
    Kp = _round_up(IN, TK)

    # ---- zero-pad operands (zeros contribute nothing to the matmul / bias) ----
    x_p = jnp.pad(x, ((0, Mp - B), (0, Kp - IN)))
    w_p = jnp.pad(w, ((0, Kp - IN), (0, Np - OUT)))
    b_p = jnp.pad(b, (0, Np - OUT)).reshape(1, Np)

    if use_bf16_matmul:
        # Optional bf16 MXU path (v6e/v7x); f32 accumulate + f32 epilogue.
        x_p = x_p.astype(jnp.bfloat16)
        w_p = w_p.astype(jnp.bfloat16)

    seed_arr = jnp.asarray([seed], dtype=jnp.int32)

    kernel = functools.partial(
        _enhanced_linear_kernel,
        tm=TM, tn=TN, n_padded=Np,
        keep_threshold=keep_threshold, keep_scale=keep_scale,
        apply_dropout=apply_dropout,
    )

    grid = (Mp // TM, Np // TN, Kp // TK)

    out_padded = pl.pallas_call(
        kernel,
        out_shape=jax.ShapeDtypeStruct((Mp, Np), x.dtype),
        grid_spec=pltpu.PrefetchScalarGridSpec(
            num_scalar_prefetch=1,          # dropout seed lives in SMEM
            grid=grid,
            in_specs=[
                pl.BlockSpec((TM, TK), lambda i, j, k, s: (i, k)),
                pl.BlockSpec((TK, TN), lambda i, j, k, s: (k, j)),
                pl.BlockSpec((1, TN), lambda i, j, k, s: (0, j)),
            ],
            out_specs=pl.BlockSpec((TM, TN), lambda i, j, k, s: (i, j)),
            scratch_shapes=[pltpu.VMEM((TM, TN), jnp.float32)],
        ),
        compiler_params=pltpu.CompilerParams(
            dimension_semantics=("parallel", "parallel", "arbitrary"),
            vmem_limit_bytes=32 * 1024 * 1024,
        ),
        cost_estimate=pl.CostEstimate(
            flops=2 * Mp * Kp * Np,
            bytes_accessed=4 * (Mp * Kp + Kp * Np + Np + Mp * Np),
            transcendentals=0,
        ),
    )(seed_arr, x_p, w_p, b_p)

    return out_padded[:B, :OUT]


if __name__ == "__main__":
    # Shapes implied by the module (Linear on a batch of vectors), kept small:
    # batch=8, in_features=32, out_features=64.
    B, IN, OUT = 8, 32, 64
    dropout_p = 0.5

    key = jax.random.PRNGKey(0)
    kx, kw, kb = jax.random.split(key, 3)

    x = jax.random.normal(kx, (B, IN), dtype=jnp.float32)

    # Deterministic PyTorch-style init: uniform(-1/sqrt(IN), 1/sqrt(IN)).
    bound = 1.0 / (IN ** 0.5)
    w = jax.random.uniform(kw, (IN, OUT), dtype=jnp.float32,
                           minval=-bound, maxval=bound)
    b = jax.random.uniform(kb, (OUT,), dtype=jnp.float32,
                           minval=-bound, maxval=bound)

    # Eval mode (dropout off == PyTorch .eval()): must match relu(x @ w + b).
    out_eval = enhanced_linear(x, w, b, dropout_p=dropout_p, training=False)
    out_eval = jax.block_until_ready(out_eval)
    ref_eval = jnp.maximum(x @ w + b, 0.0)
    assert out_eval.shape == (B, OUT)
    assert jnp.allclose(out_eval, ref_eval, atol=1e-5, rtol=1e-5)

    # Training mode: every element is either dropped (0) or scaled by 1/(1-p).
    out_train = enhanced_linear(x, w, b, dropout_p=dropout_p, training=True,
                                seed=1234)
    out_train = jax.block_until_ready(out_train)
    assert out_train.shape == (B, OUT)
    scaled = ref_eval / (1.0 - dropout_p)
    ok = jnp.all(jnp.isclose(out_train, 0.0, atol=1e-6)
                 | jnp.isclose(out_train, scaled, atol=1e-4, rtol=1e-4))
    assert bool(ok)

    print("KERNEL_OK")
</pallas_src>

<mosaic_0001>
module attributes {stable_mosaic.version = 11 : i64} {
  func.func @_enhanced_linear_kernel(%arg0: i32, %arg1: i32, %arg2: i32, %arg3: memref<1xi32, #tpu.memory_space<smem>>, %arg4: memref<8x128xf32, #tpu.memory_space<vmem>>, %arg5: memref<128x128xf32, #tpu.memory_space<vmem>>, %arg6: memref<1x128xf32, #tpu.memory_space<vmem>>, %arg7: memref<8x128xf32, #tpu.memory_space<vmem>>, %arg8: memref<8x128xf32, #tpu.memory_space<vmem>>) attributes {dimension_semantics = [#tpu.dimension_semantics<parallel>, #tpu.dimension_semantics<parallel>, #tpu.dimension_semantics<arbitrary>], iteration_bounds = array<i64: 1, 1, 1>, scalar_prefetch = 1 : i64, scratch_operands = 1 : i64, tpu.core_type = #tpu.core_type<tc>, window_params = [{transform_indices = @transform_0, window_bounds = array<i64: 8, 128>}, {transform_indices = @transform_1, window_bounds = array<i64: 128, 128>}, {transform_indices = @transform_2, window_bounds = array<i64: 1, 128>}, {transform_indices = @transform_3, window_bounds = array<i64: 8, 128>}]} {
    %c0_i32 = arith.constant 0 : i32
    %0 = arith.cmpi eq, %arg2, %c0_i32 : i32
    %1 = arith.extui %0 : i1 to i32
    %c0_i32_0 = arith.constant 0 : i32
    %2 = arith.cmpi ne, %1, %c0_i32_0 : i32
    scf.if %2 {
      %cst_10 = arith.constant 0.000000e+00 : f32
      %12 = vector.broadcast %cst_10 : f32 to vector<8x128xf32>
      %c0_11 = arith.constant 0 : index
      %c0_12 = arith.constant 0 : index
      %13 = vector.load %arg8[%c0_11, %c0_12] : memref<8x128xf32, #tpu.memory_space<vmem>>, vector<8x128xf32>
      tpu.vector_store %arg8[%c0_11, %c0_12], %12 {strides = array<i32>} : memref<8x128xf32, #tpu.memory_space<vmem>>, vector<8x128xf32>,
    } else {
    }
    %c0 = arith.constant 0 : index
    %c0_1 = arith.constant 0 : index
    %3 = vector.load %arg8[%c0, %c0_1] : memref<8x128xf32, #tpu.memory_space<vmem>>, vector<8x128xf32>
    %c0_2 = arith.constant 0 : index
    %c0_3 = arith.constant 0 : index
    %4 = vector.load %arg4[%c0_2, %c0_3] : memref<8x128xf32, #tpu.memory_space<vmem>>, vector<8x128xf32>
    %c0_4 = arith.constant 0 : index
    %c0_5 = arith.constant 0 : index
    %5 = vector.load %arg5[%c0_4, %c0_5] : memref<128x128xf32, #tpu.memory_space<vmem>>, vector<128x128xf32>
    %cst = arith.constant dense<0.000000e+00> : vector<8x128xf32>
    %6 = tpu.matmul %4, %5, %cst {dimension_numbers = #tpu.dot_dimension_numbers<[1], [0], [0], [1], [0, 0, 1, 1], [], []>} : vector<8x128xf32>, vector<128x128xf32>, vector<8x128xf32> -> vector<8x128xf32>
    %7 = arith.addf %3, %6 : vector<8x128xf32>
    %c0_6 = arith.constant 0 : index
    %c0_7 = arith.constant 0 : index
    %8 = vector.load %arg8[%c0_6, %c0_7] : memref<8x128xf32, #tpu.memory_space<vmem>>, vector<8x128xf32>
    tpu.vector_store %arg8[%c0_6, %c0_7], %7 {strides = array<i32>} : memref<8x128xf32, #tpu.memory_space<vmem>>, vector<8x128xf32>,
    %c0_i32_8 = arith.constant 0 : i32
    %9 = arith.cmpi eq, %arg2, %c0_i32_8 : i32
    %10 = arith.extui %9 : i1 to i32
    %c0_i32_9 = arith.constant 0 : i32
    %11 = arith.cmpi ne, %10, %c0_i32_9 : i32
    scf.if %11 {
      %c0_10 = arith.constant 0 : index
      %c0_11 = arith.constant 0 : index
      %12 = vector.load %arg8[%c0_10, %c0_11] : memref<8x128xf32, #tpu.memory_space<vmem>>, vector<8x128xf32>
      %c0_12 = arith.constant 0 : index
      %c0_13 = arith.constant 0 : index
      %13 = vector.load %arg6[%c0_12, %c0_13] : memref<1x128xf32, #tpu.memory_space<vmem>>, vector<1x128xf32>
      %14 = vector.broadcast %13 : vector<1x128xf32> to vector<8x128xf32>
      %15 = arith.addf %12, %14 : vector<8x128xf32>
      %cst_14 = arith.constant 0.000000e+00 : f32
      %16 = vector.broadcast %cst_14 : f32 to vector<8x128xf32>
      %17 = arith.maximumf %15, %16 : vector<8x128xf32>
      %c0_15 = arith.constant 0 : index
      %c0_16 = arith.constant 0 : index
      %18 = vector.load %arg7[%c0_15, %c0_16] : memref<8x128xf32, #tpu.memory_space<vmem>>, vector<8x128xf32>
      tpu.vector_store %arg7[%c0_15, %c0_16], %17 {strides = array<i32>} : memref<8x128xf32, #tpu.memory_space<vmem>>, vector<8x128xf32>,
    } else {
    }
    return
  }
  func.func @transform_0(%arg0: i32, %arg1: i32, %arg2: i32, %arg3: memref<1xi32, #tpu.memory_space<smem>>) -> (i32, i32) {
    %c0_i32 = arith.constant 0 : i32
    return %arg0, %arg2 : i32, i32
  }
  func.func @transform_1(%arg0: i32, %arg1: i32, %arg2: i32, %arg3: memref<1xi32, #tpu.memory_space<smem>>) -> (i32, i32) {
    %c0_i32 = arith.constant 0 : i32
    return %arg2, %arg1 : i32, i32
  }
  func.func @transform_2(%arg0: i32, %arg1: i32, %arg2: i32, %arg3: memref<1xi32, #tpu.memory_space<smem>>) -> (i32, i32) {
    %c0_i32 = arith.constant 0 : i32
    %c0_i32_0 = arith.constant 0 : i32
    return %c0_i32, %arg1 : i32, i32
  }
  func.func @transform_3(%arg0: i32, %arg1: i32, %arg2: i32, %arg3: memref<1xi32, #tpu.memory_space<smem>>) -> (i32, i32) {
    %c0_i32 = arith.constant 0 : i32
    return %arg0, %arg1 : i32, i32
  }
}

</mosaic_0001>

<bundles_post_ra>
// kernel: tpu_custom_call.1
= control target key start
LH: loop header
LB: loop body
LE: loop exit
PB: predicated region body
PF: predicated region fallthrough
CT: control target
= control target key end

     0   :  { %10 = vsyncpa [#allocation6], 0  ;;  %s404_s0 = inlined_call_operand.<no memory space> [shape: s32[1], index: 0, kind: input, shape index: {}]   ;;  %s405_s1 = inlined_call_operand.hbm [shape: f32[8,128], index: 1, kind: input, shape index: {}]   ;;  %s406_s2 = inlined_call_operand.hbm [shape: f32[128,128], index: 2, kind: input, shape index: {}]   ;;  %s407_s3 = inlined_call_operand.vmem [shape: f32[1,128], index: 3, kind: input, shape index: {}]   ;;  %s408_s4 = inlined_call_operand.hbm [shape: f32[8,128], index: 4, kind: output, shape index: {}]  }
   0x1   :  { %11 = vsyncpa [#allocation9], 0 }
   0x2   :  { %12 = vsyncpa [#allocation7], 0  ;;  %s325_s15 = smov [#allocation5]   ;;  %s326_s17 = smov [#allocation8]  }
   0x3   :  { %s19_s16 = sshll.u32 %s325_s15, 4  ;;  %s28_s18 = sshll.u32 %s326_s17, 4  ;;  %s20_s16 = int_to_ptr.vmem [resolvable:$true] %s19_s16  ;;  %s358_s18 = int_to_ptr.vmem [resolvable:$true] %s28_s18 }
   0x4   :  { %s253_s20 = scalar_lea.hbm %s405_s1, 128 }
   0x5   :  { %p254_p0 = scmp.ne.s32.totalorder %s405_s1, %s253_s20  ;;  %p257_p1 = scmp.lt.u32.totalorder %s253_s20, %s405_s1 }
   0x7   :  { %p259_p2 = pnand %p257_p1, %p254_p0 }
   0x9   :  { %262 = shalt.err (!%p259_p2)
}
   0xa   :  { %s263_s25 = scalar_lea.vmem %s20_s16, 128  ;;  %p268_p4 = scmp.lt.s32.totalorder %s20_s16, %s20_s16 }
   0xb   :  { %p264_p3 = scmp.ne.s32.totalorder %s20_s16, %s263_s25  ;;  %p269_p5 = scmp.lt.s32.totalorder %s263_s25, %s263_s25 }
   0xd   :  { %p270_p6 = por %p269_p5, %p268_p4 }
   0xf   :  { %p271_p7 = pnand %p270_p6, %p264_p3 }
  0x11   :  { %274 = shalt.err (!%p271_p7)
}
  0x12   :  { %22 = dma.hbm_to_vmem [thread:$0]  %s405_s1, 128, %s20_s16, [#allocation6]  }
  0x13   :  { %s275_s30 = scalar_lea.hbm %s406_s2, 2048 }
  0x14   :  { %p276_p8 = scmp.ne.s32.totalorder %s406_s2, %s275_s30  ;;  %p279_p9 = scmp.lt.u32.totalorder %s275_s30, %s406_s2 }
  0x16   :  { %p281_p10 = pnand %p279_p9, %p276_p8 }
  0x18   :  { %284 = shalt.err (!%p281_p10)
}
  0x19   :  { %s285_s9 = scalar_lea.vmem %s358_s18, 2048  ;;  %p290_p12 = scmp.lt.s32.totalorder %s358_s18, %s358_s18 }
  0x1a   :  { %p286_p11 = scmp.ne.s32.totalorder %s358_s18, %s285_s9  ;;  %p291_p13 = scmp.lt.s32.totalorder %s285_s9, %s285_s9 }
  0x1c   :  { %p292_p0 = por %p291_p13, %p290_p12 }
  0x1e   :  { %p293_p1 = pnand %p292_p0, %p286_p11 }
  0x20   :  { %296 = shalt.err (!%p293_p1)
}
  0x21   :  { %s327_s1 = smov 128   ;;  %s328_s10 = smov 8  }
  0x22   :  { %34 = dma.hbm_to_vmem [thread:$0]  %s406_s2, 2048, %s358_s18, [#allocation9], %s327_s1, %s327_s1, %s328_s10  }
  0x23   :  { %319 = dma.done.wait [#allocation6], 128  }
  0x24   :  { %320 = vsyncadd [#allocation6], 4294967168 }
  0x25   :  { %321 = dma.done.wait [#allocation9], 2048  }
  0x26   :  { %322 = vsyncadd [#allocation9], 4294965248  ;;  %v329_v0 = vmov 0.0|0.0   ;;  %vm330_vm0 = vmmov 0   ;;  %v331_v1 = vmov 0.0   ;;  %v50_v2 = vld [vmem:[#allocation8] sm:$0xff] }
  0x27   :  { %221 = vmatprep.subr.bf16.mxu0 %v329_v0  ;;  %218 = vmatprep.mubr.msk.f32.mxu0 %vm330_vm0, %v331_v1  ;;  %v51_v3 = vld [vmem:[#allocation8 + $0x8] sm:$0xff]  ;;  %v52_v4 = vld [vmem:[#allocation8 + $0x10] sm:$0xff]  ;;  %v53_v6 = vld [vmem:[#allocation8 + $0x18] sm:$0xff]  ;;  %s332_s14 = smov [#allocation10]  }
  0x28   :  { %v222_v5 = vpack.c.bf16 %v51_v3, %v50_v2  ;;  %v225_v7 = vpack.c.bf16 %v53_v6, %v52_v4  ;;  %v54_v8 = vld [vmem:[#allocation8 + $0x20] sm:$0xff]  ;;  %v55_v9 = vld [vmem:[#allocation8 + $0x28] sm:$0xff]  ;;  %v56_v11 = vld [vmem:[#allocation8 + $0x30] sm:$0xff]  ;;  %s158_s15 = sshll.u32 %s332_s14, 4  ;;  %s159_s15 = int_to_ptr.vmem [resolvable:$true] %s158_s15 }
  0x29   :  { %v228_v10 = vpack.c.bf16 %v55_v9, %v54_v8  ;;  %v57_v12 = vld [vmem:[#allocation8 + $0x38] sm:$0xff]  ;;  %v58_v14 = vld [vmem:[#allocation8 + $0x40] sm:$0xff]  ;;  %v59_v15 = vld [vmem:[#allocation8 + $0x48] sm:$0xff]  ;;  %s297_s16 = scalar_lea.vmem %s159_s15, 128  ;;  %p302_p3 = scmp.lt.s32.totalorder %s159_s15, %s159_s15 }
  0x2a   :  { %223 = vmatpush3.bf16.msra.mxu0 %v222_v5  ;;  %v231_v13 = vpack.c.bf16 %v57_v12, %v56_v11  ;;  %v234_v16 = vpack.c.bf16 %v59_v15, %v58_v14  ;;  %v60_v17 = vld [vmem:[#allocation8 + $0x50] sm:$0xff]  ;;  %v61_v18 = vld [vmem:[#allocation8 + $0x58] sm:$0xff]  ;;  %v62_v20 = vld [vmem:[#allocation8 + $0x60] sm:$0xff]  ;;  %p298_p2 = scmp.ne.s32.totalorder %s159_s15, %s297_s16  ;;  %p303_p4 = scmp.lt.s32.totalorder %s297_s16, %s297_s16 }
  0x2b   :  { %224 = vmatprep.subr.bf16.mxu0 %v329_v0  ;;  %v237_v19 = vpack.c.bf16 %v61_v18, %v60_v17  ;;  %v63_v21 = vld [vmem:[#allocation8 + $0x68] sm:$0xff]  ;;  %v64_v23 = vld [vmem:[#allocation8 + $0x70] sm:$0xff]  ;;  %v65_v24 = vld [vmem:[#allocation8 + $0x78] sm:$0xff] }
  0x2c   :  { %v240_v22 = vpack.c.bf16 %v63_v21, %v62_v20  ;;  %v243_v25 = vpack.c.bf16 %v65_v24, %v64_v23  ;;  %v49_v26 = vld [vmem:[#allocation5] sm:$0xff]  ;;  %p304_p5 = por %p303_p4, %p302_p3 }
  0x2d   :  { %v168_v27 = vld [vmem:[%s407_s3] ss:$0 sm:$0xff] }
  0x2e   :  { %226 = vmatpush3.bf16.msra.mxu0 %v225_v7  ;;  %p305_p6 = pnand %p304_p5, %p298_p2 }
  0x2f   :  { %227 = vmatprep.subr.bf16.mxu0 %v329_v0 }
  0x32   :  { %229 = vmatpush3.bf16.msra.mxu0 %v228_v10 }
  0x33   :  { %230 = vmatprep.subr.bf16.mxu0 %v329_v0 }
  0x36   :  { %232 = vmatpush3.bf16.msra.mxu0 %v231_v13 }
  0x37   :  { %233 = vmatprep.subr.bf16.mxu0 %v329_v0 }
  0x3a   :  { %235 = vmatpush3.bf16.msra.mxu0 %v234_v16 }
  0x3b   :  { %236 = vmatprep.subr.bf16.mxu0 %v329_v0 }
  0x3e   :  { %238 = vmatpush3.bf16.msra.mxu0 %v237_v19 }
  0x3f   :  { %239 = vmatprep.subr.bf16.mxu0 %v329_v0 }
  0x42   :  { %241 = vmatpush3.bf16.msra.mxu0 %v240_v22 }
  0x43   :  { %242 = vmatprep.subr.bf16.mxu0 %v329_v0 }
  0x46   :  { %244 = vmatpush3.bf16.msra.mxu0 %v243_v25 }
  0x49   :  { %219 = vmatmul.mubr.f32.vlgmr.msra.gmra.mrb[0].mxu0 %v49_v26 }
 0x11c   :  { %v132_v28 = vpop.f32.mrb[0].mxu0 }
 0x11d   :  { %v149_v29 = vadd.f32 %v168_v27, %v132_v28  ;;  %v220_v30 = vpop.f32.mrb[1].mxu0 }
 0x11f   :  { %v150_v31 = vmax.f32 %v149_v29, 0.0 }
 0x121   :  { %151 = vst [vmem:[#allocation10] sm:$0xff] %v150_v31 }
 0x122   :  { %308 = shalt.err (!%p305_p6)
}
 0x123   :  { %s309_s0 = scalar_lea.hbm %s408_s4, 128 }
 0x124   :  { %p310_p7 = scmp.ne.s32.totalorder %s408_s4, %s309_s0  ;;  %p313_p8 = scmp.lt.u32.totalorder %s309_s0, %s408_s4 }
 0x126   :  { %p315_p9 = pnand %p313_p8, %p310_p7 }
 0x128   :  { %318 = shalt.err (!%p315_p9)
}
 0x129   :  { %161 = dma.vmem_to_hbm [thread:$0]  %s159_s15, 128, %s408_s4, [#allocation7]  }
 0x12a   :  { %323 = dma.done.wait [#allocation7], 128  }
 0x12b   :  { %324 = vsyncadd [#allocation7], 4294967168 }
 0x12c   :  { %165 = vsyncpa [#allocation6], 1 }
 0x12d   :  { %166 = vsyncpa [#allocation9], 1 }
 0x12e   :  { %167 = vsyncpa [#allocation7], 1 }

</bundles_post_ra>
